<compile_context>
chip_gen: v7x
topology: tpu7x:2x2x1
jax: 0.10.0
libtpu: 0.0.40
codegen_flags: <defaults>
</compile_context>

<pallas_src>
import jax
import jax.numpy as jnp
from jax.experimental import pallas as pl
from jax.experimental.pallas import tpu as pltpu


def _round_up(x: int, m: int) -> int:
    return ((x + m - 1) // m) * m


# ----------------------------------- kernels ---------------------------------

def _proto_matmul_kernel(x_ref, wt_ref, o_ref):
    # x_ref : (tile_b, K)      VMEM, f32  (cast to bf16 on the VPU, free under MXU/DMA)
    # wt_ref: (K, tile_n)      VMEM, bf16 (pre-transposed, 256-padded prototypes)
    # o_ref : (tile_b, tile_n) VMEM, out dtype
    o_ref[...] = jnp.dot(
        x_ref[...].astype(wt_ref.dtype), wt_ref[...],
        preferred_element_type=jnp.float32,
    ).astype(o_ref.dtype)


def _proto_matmul_kernel_ktiled(x_ref, wt_ref, o_ref, acc_ref):
    # Trailing "arbitrary" K axis with an f32 VMEM accumulator (large feat_dim).
    k = pl.program_id(2)

    @pl.when(k == 0)
    def _():
        acc_ref[...] = jnp.zeros_like(acc_ref)

    acc_ref[...] += jnp.dot(
        x_ref[...].astype(wt_ref.dtype), wt_ref[...],
        preferred_element_type=jnp.float32,
    )

    @pl.when(k == pl.num_programs(2) - 1)
    def _():
        o_ref[...] = acc_ref[...].astype(o_ref.dtype)


# ------------------------------- host-side API --------------------------------

_VMEM_BLOCK_BUDGET = 20 * 1024 * 1024   # keep double-buffered blocks v7x-safe (64 MiB physical)
_MIN_PALLAS_FLOPS = 1 << 22             # below this, plain XLA dot beats pallas_call overhead


def prepare_classifier_weights(w, *, compute_dtype=jnp.bfloat16, lane_pad=256):
    """One-time prototype-weight prep (do NOT call per forward).

    w: (n_classes, feat_dim) float32   (nn.Linear weight layout)
    returns: (feat_dim, n_pad) compute_dtype, n_pad = round_up(n_classes, lane_pad),
             extra class columns zero-padded (256-padding keeps the MXU N dim wide).
    """
    n_classes, feat_dim = w.shape
    n_pad = _round_up(max(n_classes, lane_pad), lane_pad)
    wt = w.T.astype(compute_dtype)                      # (feat_dim, n_classes)
    if n_pad != n_classes:
        wt = jnp.pad(wt, ((0, 0), (0, n_pad - n_classes)))
    return wt


def classifier_head_forward(
    x,
    wt_prepared,
    n_classes: int,
    *,
    tile_b=None,
    tile_n=None,
    tile_k=None,
    out_dtype=jnp.float32,
    allow_fallback: bool = True,
):
    """Bias-free prototype classifier: logits = x @ W.T  (eval-mode forward).

    x:            (batch, feat_dim) float32 (cast to bf16 inside the kernel)
    wt_prepared:  (feat_dim, n_pad) from prepare_classifier_weights (n_pad % 256 == 0)
    out_dtype:    jnp.float32 (default) or jnp.bfloat16 if downstream tolerates it
    returns:      (batch, n_classes) out_dtype
    """
    batch, feat_dim = x.shape
    kdim, n_pad = wt_prepared.shape
    assert kdim == feat_dim, "feature-dim mismatch between inputs and prepared weights"
    assert n_pad % 128 == 0 and n_pad >= n_classes

    # TODO(synk): training-mode Dropout(p=0.2) not applied; eval-mode forward only.

    # Tiny problems: pallas_call fixed per-step overhead + slicing exceeds the matmul.
    if allow_fallback and 2 * batch * n_pad * feat_dim < _MIN_PALLAS_FLOPS:
        logits = jnp.dot(
            x.astype(wt_prepared.dtype), wt_prepared,
            preferred_element_type=jnp.float32,
        ).astype(out_dtype)
        return logits[:, :n_classes]

    x_bytes = x.dtype.itemsize            # f32 x blocks; bf16 cast happens in-kernel
    w_bytes = wt_prepared.dtype.itemsize
    o_bytes = jnp.dtype(out_dtype).itemsize

    # ---- class (N) tile: lane-dense, 256/512-wide for the 256-wide MXUs --------
    if tile_n is None:
        if n_pad <= 512:
            tile_n = n_pad
        elif n_pad % 512 == 0:
            tile_n = 512
        else:
            tile_n = 256                  # n_pad is always a multiple of 256
    assert n_pad % tile_n == 0 and tile_n % 128 == 0

    def _footprint(tb, tk, ktiled):
        f = (2 * tb * tk * x_bytes        # double-buffered x blocks
             + 2 * tk * tile_n * w_bytes  # double-buffered weight blocks
             + 2 * tb * tile_n * o_bytes)  # double-buffered output blocks
        if ktiled:
            f += tb * tile_n * 4          # f32 accumulator scratch
        return f

    # ---- batch (M) tile ---------------------------------------------------------
    tb = 512 if tile_b is None else tile_b
    tb = min(tb, batch)
    if tb < batch:
        tb = max(8, (tb // 8) * 8)        # partial-batch tiles must be sublane aligned

    # ---- K handling: full-K blocks unless they would blow the VMEM budget -------
    if (tile_k is not None and tile_k < feat_dim
            and feat_dim % tile_k == 0 and tile_k % 128 == 0):
        use_ktile = True                  # explicit override (also used for testing)
    elif feat_dim % 128 == 0 and _footprint(tb, feat_dim, False) > _VMEM_BLOCK_BUDGET:
        use_ktile = True
        tile_k = next(t for t in (2048, 1024, 512, 256, 128) if feat_dim % t == 0)
    else:
        use_ktile = False
        tile_k = feat_dim
        while _footprint(tb, feat_dim, False) > _VMEM_BLOCK_BUDGET and tb > 8:
            tb = max(8, (tb // 2 // 8) * 8)

    if use_ktile:
        while _footprint(tb, tile_k, True) > _VMEM_BLOCK_BUDGET and tb > 8:
            tb = max(8, (tb // 2 // 8) * 8)
    tile_b = tb

    # ---- batch padding only when the batch is not a multiple of the batch tile --
    if batch % tile_b == 0:
        b_pad, xp = batch, x
    else:
        # TODO(synk): this zero-pad is one extra pass over x; only hit when batch
        # is not a multiple of the chosen batch tile.
        b_pad = _round_up(batch, tile_b)
        xp = jnp.pad(x, ((0, b_pad - batch), (0, 0)))

    n_i = b_pad // tile_b
    n_j = n_pad // tile_n

    # v7x has two TensorCores: ensure >=2 blocks along at least one parallel axis.
    if n_i == 1 and n_j == 1:
        if n_pad >= 512:
            tile_n = n_pad // 2           # still a multiple of 128 (n_pad % 256 == 0)
            n_j = 2
        elif batch % 16 == 0 and batch >= 32:
            tile_b = batch // 2
            n_i = 2

    # ---- cost estimate (advisory) ------------------------------------------------
    if use_ktile:
        bytes_accessed = (n_j * b_pad * feat_dim * x_bytes
                          + n_i * feat_dim * n_pad * w_bytes
                          + b_pad * n_pad * o_bytes)
    else:
        # class-outer grid: W streamed once, x streamed once per class tile
        bytes_accessed = (n_j * b_pad * feat_dim * x_bytes
                          + feat_dim * n_pad * w_bytes
                          + b_pad * n_pad * o_bytes)
    cost = pl.CostEstimate(flops=2 * b_pad * n_pad * feat_dim,
                           transcendentals=0,
                           bytes_accessed=int(bytes_accessed))

    # Raise v5e's 16 MiB scoped default; stays well within v7x's 64 MiB physical.
    vmem_limit = int(min(100 << 20,
                         max(32 << 20,
                             _footprint(tile_b, tile_k, use_ktile) * 5 // 4 + (2 << 20))))
    cparams = pltpu.CompilerParams(
        dimension_semantics=(("parallel", "parallel", "arbitrary") if use_ktile
                             else ("parallel", "parallel")),
        vmem_limit_bytes=vmem_limit,
    )

    if use_ktile:
        n_k = feat_dim // tile_k
        out_padded = pl.pallas_call(
            _proto_matmul_kernel_ktiled,
            out_shape=jax.ShapeDtypeStruct((b_pad, n_pad), out_dtype),
            grid=(n_j, n_i, n_k),                         # class, batch, K (reduction last)
            in_specs=[
                pl.BlockSpec((tile_b, tile_k), lambda j, i, k: (i, k)),
                pl.BlockSpec((tile_k, tile_n), lambda j, i, k: (k, j)),
            ],
            out_specs=pl.BlockSpec((tile_b, tile_n), lambda j, i, k: (i, j)),
            scratch_shapes=[pltpu.VMEM((tile_b, tile_n), jnp.float32)],
            compiler_params=cparams,
            cost_estimate=cost,
        )(xp, wt_prepared)
    else:
        out_padded = pl.pallas_call(
            _proto_matmul_kernel,
            out_shape=jax.ShapeDtypeStruct((b_pad, n_pad), out_dtype),
            grid=(n_j, n_i),                              # class OUTER, batch inner:
                                                          # each W block is DMA'd once,
                                                          # (smaller) x tiles re-stream
            in_specs=[
                pl.BlockSpec((tile_b, feat_dim), lambda j, i: (i, 0)),
                pl.BlockSpec((feat_dim, tile_n), lambda j, i: (0, j)),
            ],
            out_specs=pl.BlockSpec((tile_b, tile_n), lambda j, i: (i, j)),
            compiler_params=cparams,
            cost_estimate=cost,
        )(xp, wt_prepared)

    # Slice off batch / class padding (lane-dense stores happened inside the kernel).
    return out_padded[:batch, :n_classes]


def init_classifier_head_params(key, feature_size, n_classes):
    """Deterministic init mimicking nn.Linear(feature_size, n_classes, bias=False):
    kaiming-uniform => U(-1/sqrt(fan_in), 1/sqrt(fan_in))."""
    bound = 1.0 / jnp.sqrt(jnp.float32(feature_size))
    return jax.random.uniform(
        key, (n_classes, feature_size), dtype=jnp.float32, minval=-bound, maxval=bound
    )


if __name__ == "__main__":
    key = jax.random.PRNGKey(0)
    k1, k2, k3, k4 = jax.random.split(key, 4)

    # --- Case 1: small ClassifierHead shapes: inputs (batch, feat_dim) -> (batch, n_classes)
    batch, feature_size, n_classes = 8, 32, 10
    x = jax.random.normal(k1, (batch, feature_size), dtype=jnp.float32)
    w = init_classifier_head_params(k2, feature_size, n_classes)

    wt = prepare_classifier_weights(w)                       # one-time weight prep
    logits = classifier_head_forward(x, wt, n_classes, allow_fallback=False)  # force Pallas path
    logits = jax.block_until_ready(logits)
    assert logits.shape == (batch, n_classes)

    ref_bf16 = jnp.dot(x.astype(jnp.bfloat16), w.T.astype(jnp.bfloat16),
                       preferred_element_type=jnp.float32)
    ref_f32 = x @ w.T
    assert jnp.allclose(logits, ref_bf16, atol=1e-3, rtol=1e-3)
    assert jnp.allclose(logits, ref_f32, atol=5e-2, rtol=5e-2)

    # Small-problem fallback path (plain XLA dot) must agree with the kernel.
    logits_fb = jax.block_until_ready(classifier_head_forward(x, wt, n_classes))
    assert jnp.allclose(logits_fb, logits, atol=1e-3, rtol=1e-3)

    # --- Case 2: multi-tile class grid (>=2 parallel blocks, W streamed once)
    n_classes2 = 300
    w2 = init_classifier_head_params(k3, feature_size, n_classes2)
    wt2 = prepare_classifier_weights(w2)
    logits2 = jax.block_until_ready(
        classifier_head_forward(x, wt2, n_classes2, allow_fallback=False))
    ref2 = jnp.dot(x.astype(jnp.bfloat16), w2.T.astype(jnp.bfloat16),
                   preferred_element_type=jnp.float32)
    assert logits2.shape == (batch, n_classes2)
    assert jnp.allclose(logits2, ref2, atol=1e-3, rtol=1e-3)

    # --- Case 3: exercise the K-tiled accumulator path (tile_k override)
    feat3, batch3, n_classes3 = 256, 16, 10
    x3 = jax.random.normal(k4, (batch3, feat3), dtype=jnp.float32)
    w3 = init_classifier_head_params(k2, feat3, n_classes3)
    wt3 = prepare_classifier_weights(w3)
    logits3 = jax.block_until_ready(
        classifier_head_forward(x3, wt3, n_classes3, tile_k=128, allow_fallback=False))
    ref3 = jnp.dot(x3.astype(jnp.bfloat16), w3.T.astype(jnp.bfloat16),
                   preferred_element_type=jnp.float32)
    assert logits3.shape == (batch3, n_classes3)
    assert jnp.allclose(logits3, ref3, atol=2e-3, rtol=2e-3)

    print("KERNEL_OK")
</pallas_src>

<mosaic_0001>
module attributes {stable_mosaic.version = 11 : i64} {
  func.func @_proto_matmul_kernel(%arg0: i32, %arg1: i32, %arg2: memref<8x32xf32, #tpu.memory_space<vmem>>, %arg3: memref<32x256xbf16, #tpu.memory_space<vmem>>, %arg4: memref<8x256xf32, #tpu.memory_space<vmem>>) attributes {dimension_semantics = [#tpu.dimension_semantics<parallel>, #tpu.dimension_semantics<parallel>], iteration_bounds = array<i64: 1, 1>, scalar_prefetch = 0 : i64, scratch_operands = 0 : i64, tpu.core_type = #tpu.core_type<tc>, window_params = [{transform_indices = @transform_0, window_bounds = array<i64: 8, 32>}, {transform_indices = @transform_1, window_bounds = array<i64: 32, 256>}, {transform_indices = @transform_2, window_bounds = array<i64: 8, 256>}]} {
    %c0 = arith.constant 0 : index
    %c0_0 = arith.constant 0 : index
    %0 = vector.load %arg2[%c0, %c0_0] : memref<8x32xf32, #tpu.memory_space<vmem>>, vector<8x32xf32>
    %1 = arith.truncf %0 : vector<8x32xf32> to vector<8x32xbf16>
    %c0_1 = arith.constant 0 : index
    %c0_2 = arith.constant 0 : index
    %2 = vector.load %arg3[%c0_1, %c0_2] : memref<32x256xbf16, #tpu.memory_space<vmem>>, vector<32x256xbf16>
    %cst = arith.constant dense<0.000000e+00> : vector<8x256xf32>
    %3 = tpu.matmul %1, %2, %cst {dimension_numbers = #tpu.dot_dimension_numbers<[1], [0], [0], [1], [0, 0, 1, 1], [], []>} : vector<8x32xbf16>, vector<32x256xbf16>, vector<8x256xf32> -> vector<8x256xf32>
    %c0_3 = arith.constant 0 : index
    %c0_4 = arith.constant 0 : index
    %4 = vector.load %arg4[%c0_3, %c0_4] : memref<8x256xf32, #tpu.memory_space<vmem>>, vector<8x256xf32>
    tpu.vector_store %arg4[%c0_3, %c0_4], %3 {strides = array<i32>} : memref<8x256xf32, #tpu.memory_space<vmem>>, vector<8x256xf32>,
    return
  }
  func.func @transform_0(%arg0: i32, %arg1: i32) -> (i32, i32) {
    %c0_i32 = arith.constant 0 : i32
    %c0_i32_0 = arith.constant 0 : i32
    return %arg1, %c0_i32 : i32, i32
  }
  func.func @transform_1(%arg0: i32, %arg1: i32) -> (i32, i32) {
    %c0_i32 = arith.constant 0 : i32
    %c0_i32_0 = arith.constant 0 : i32
    return %c0_i32, %arg0 : i32, i32
  }
  func.func @transform_2(%arg0: i32, %arg1: i32) -> (i32, i32) {
    %c0_i32 = arith.constant 0 : i32
    return %arg1, %arg0 : i32, i32
  }
}

</mosaic_0001>

<bundles_post_ra>
// kernel: tpu_custom_call.1
= control target key start
LH: loop header
LB: loop body
LE: loop exit
PB: predicated region body
PF: predicated region fallthrough
CT: control target
= control target key end

     0   :  { %7 = vsyncpa [#allocation3], 0  ;;  %s281_s0 = inlined_call_operand.hbm [shape: f32[8,32], index: 0, kind: input, shape index: {}]   ;;  %s282_s1 = inlined_call_operand.hbm [shape: bf16[32,256], index: 1, kind: input, shape index: {}]   ;;  %s283_s2 = inlined_call_operand.hbm [shape: f32[8,256], index: 2, kind: output, shape index: {}]  }
   0x1   :  { %8 = vsyncpa [#allocation6], 0 }
   0x2   :  { %9 = vsyncpa [#allocation4], 0  ;;  %s217_s9 = smov [#allocation2]   ;;  %s218_s11 = smov [#allocation5]  }
   0x3   :  { %s16_s10 = sshll.u32 %s217_s9, 4  ;;  %s25_s12 = sshll.u32 %s218_s11, 4  ;;  %s17_s10 = int_to_ptr.vmem [resolvable:$true] %s16_s10  ;;  %s238_s12 = int_to_ptr.vmem [resolvable:$true] %s25_s12 }
   0x4   :  { %s145_s15 = scalar_lea.hbm %s281_s0, 128 }
   0x5   :  { %p146_p0 = scmp.ne.s32.totalorder %s281_s0, %s145_s15  ;;  %p149_p1 = scmp.lt.u32.totalorder %s145_s15, %s281_s0 }
   0x7   :  { %p151_p2 = pnand %p149_p1, %p146_p0 }
   0x9   :  { %154 = shalt.err (!%p151_p2)
}
   0xa   :  { %s155_s20 = scalar_lea.vmem %s17_s10, 128  ;;  %p160_p4 = scmp.lt.s32.totalorder %s17_s10, %s17_s10 }
   0xb   :  { %p156_p3 = scmp.ne.s32.totalorder %s17_s10, %s155_s20  ;;  %p161_p5 = scmp.lt.s32.totalorder %s155_s20, %s155_s20 }
   0xd   :  { %p162_p6 = por %p161_p5, %p160_p4 }
   0xf   :  { %p163_p7 = pnand %p162_p6, %p156_p3 }
  0x11   :  { %166 = shalt.err (!%p163_p7)
}
  0x12   :  { %19 = dma.hbm_to_vmem [thread:$0]  %s281_s0, 128, %s17_s10, [#allocation3]  }
  0x13   :  { %s167_s25 = scalar_lea.hbm %s282_s1, 512 }
  0x14   :  { %p168_p8 = scmp.ne.s32.totalorder %s282_s1, %s167_s25  ;;  %p171_p9 = scmp.lt.u32.totalorder %s167_s25, %s282_s1 }
  0x16   :  { %p173_p10 = pnand %p171_p9, %p168_p8 }
  0x18   :  { %176 = shalt.err (!%p173_p10)
}
  0x19   :  { %s177_s30 = scalar_lea.vmem %s238_s12, 512  ;;  %p182_p12 = scmp.lt.s32.totalorder %s238_s12, %s238_s12 }
  0x1a   :  { %p178_p11 = scmp.ne.s32.totalorder %s238_s12, %s177_s30  ;;  %p183_p13 = scmp.lt.s32.totalorder %s177_s30, %s177_s30 }
  0x1c   :  { %p184_p0 = por %p183_p13, %p182_p12 }
  0x1e   :  { %p185_p1 = pnand %p184_p0, %p178_p11 }
  0x20   :  { %188 = shalt.err (!%p185_p1)
}
  0x21   :  { %s219_s0 = smov 128   ;;  %s220_s3 = smov 8  }
  0x22   :  { %31 = dma.hbm_to_vmem [thread:$0]  %s282_s1, 512, %s238_s12, [#allocation6], %s219_s0, %s219_s0, %s220_s3  }
  0x23   :  { %211 = dma.done.wait [#allocation3], 128  }
  0x24   :  { %212 = vsyncadd [#allocation3], 4294967168 }
  0x25   :  { %213 = dma.done.wait [#allocation6], 512  }
  0x26   :  { %214 = vsyncadd [#allocation6], 4294966784  ;;  %v221_v0 = vmov 0   ;;  %v139_v1 = vld [vmem:[#allocation5 + $0x4] ss:$8 sps:$4 sm:$0xff]   ;;  %v39_v5 = vld [vmem:[#allocation2] sm:$0xff] }
  0x27   :  { %101 = vmatprep.mubr.bf16.mxu0 %v221_v0  ;;  %v141_v2 = vld [vmem:[#allocation5] ss:$8 sps:$4 sm:$0xff]   ;;  %69 = vmatprep.subr.bf16.mxu0 %v139_v1  ;;  %v142_v3 = vld [vmem:[#allocation5 + $0x14] ss:$8 sps:$4 sm:$0xff]   ;;  %v144_v4 = vld [vmem:[#allocation5 + $0x10] ss:$8 sps:$4 sm:$0xff]   ;;  %v40_v6 = vpack.c.bf16 %v39_v5, %v39_v5 }
  0x28   :  { %70 = vmatpush1.bf16.msra.mxu0 %v141_v2  ;;  %vm65_vm0 = vcmask 261120   ;;  %s222_s6 = smov [#allocation7]  }
  0x29   :  { %71 = vmatprep.subr.bf16.mxu0 %v142_v3  ;;  %s118_s1 = sshll.u32 %s222_s6, 4  ;;  %s119_s1 = int_to_ptr.vmem [resolvable:$true] %s118_s1 }
  0x2a   :  { %s189_s7 = scalar_lea.vmem %s119_s1, 256  ;;  %p194_p3 = scmp.lt.s32.totalorder %s119_s1, %s119_s1 }
  0x2b   :  { %p190_p2 = scmp.ne.s32.totalorder %s119_s1, %s189_s7  ;;  %p195_p4 = scmp.lt.s32.totalorder %s189_s7, %s189_s7 }
  0x2c   :  { %72 = vmatpush1.bf16.msra.mxu0 %v144_v4 }
  0x2d   :  { %p196_p5 = por %p195_p4, %p194_p3 }
  0x2f   :  { %132 = vmatmul.mubr.msk.bf16.vlgmr.msra.gmra.mrb[0].mxu0 %vm65_vm0, %v40_v6  ;;  %p197_p6 = pnand %p196_p5, %p190_p2 }
 0x102   :  { %v103_v7 = vpop.f32.mrb[0].mxu0 }
 0x103   :  { %110 = vst [vmem:[#allocation7] sm:$0xff] %v103_v7  ;;  %v105_v8 = vpop.f32.mrb[1].mxu0 }
 0x104   :  { %111 = vst [vmem:[#allocation7 + $0x8] sm:$0xff] %v105_v8  ;;  %v107_v9 = vpop.f32.mrb[2].mxu0 }
 0x105   :  { %v108_v10 = vpop.f32.mrb[3].mxu0 }
 0x106   :  { %200 = shalt.err (!%p197_p6)
}
 0x107   :  { %s201_s10 = scalar_lea.hbm %s283_s2, 256 }
 0x108   :  { %p202_p7 = scmp.ne.s32.totalorder %s283_s2, %s201_s10  ;;  %p205_p8 = scmp.lt.u32.totalorder %s201_s10, %s283_s2 }
 0x10a   :  { %p207_p9 = pnand %p205_p8, %p202_p7 }
 0x10c   :  { %210 = shalt.err (!%p207_p9)
}
 0x10d   :  { %121 = dma.vmem_to_hbm [thread:$0]  %s119_s1, 256, %s283_s2, [#allocation4]  }
 0x10e   :  { %215 = dma.done.wait [#allocation4], 256  }
 0x10f   :  { %216 = vsyncadd [#allocation4], 4294967040 }
 0x110   :  { %125 = vsyncpa [#allocation3], 1 }
 0x111   :  { %126 = vsyncpa [#allocation6], 1 }
 0x112   :  { %127 = vsyncpa [#allocation4], 1 }

</bundles_post_ra>
